<compile_context>
chip_gen: v7x
topology: tpu7x:2x2x1
jax: 0.10.0
libtpu: 0.0.40
codegen_flags: <defaults>
</compile_context>

<pallas_src>
import functools

import numpy as np
import jax
import jax.numpy as jnp
from jax.experimental import pallas as pl
from jax.experimental.pallas import tpu as pltpu

_BATCH_TILE = 1024  # default max batch rows per grid step (multiple of 8)


def _ceil_to(x, m):
    return ((x + m - 1) // m) * m


# --------------------------------------------------------------------------
# Kernel: whole NNARX forward for one batch tile.  Weight refs use a constant
# index_map so they stay resident in VMEM across the batch grid.
# --------------------------------------------------------------------------
def _nnarx_kernel(*refs, num_layers, out_features, blk, compute_dtype):
    u_ref, x0_ref, w0_ref = refs[0], refs[1], refs[2]
    pos = 3
    u_mats = refs[pos:pos + num_layers]
    pos += num_layers
    b_vecs = refs[pos:pos + num_layers]
    pos += num_layers
    uout_ref, bout_ref = refs[pos], refs[pos + 1]
    pos += 2
    y_ref, xp_ref = refs[pos], refs[pos + 1]

    f32 = jnp.float32
    cd = compute_dtype
    u = u_ref[...]                       # (bm, in_features)   f32
    x0 = x0_ref[...]                     # (bm, state)         f32

    # ---- FFNN: layer 0 has both input and state feed (input_feedthrough=False
    # for the hidden layers, as in the reference module's default) -------------
    x = jnp.tanh(
        jnp.dot(u.astype(cd), w0_ref[...], preferred_element_type=f32)
        + jnp.dot(x0.astype(cd), u_mats[0][...], preferred_element_type=f32)
        + b_vecs[0][...]
    )
    for i in range(1, num_layers):
        x = jnp.tanh(
            jnp.dot(x.astype(cd), u_mats[i][...], preferred_element_type=f32)
            + b_vecs[i][...]
        )
    y = jnp.dot(x.astype(cd), uout_ref[...], preferred_element_type=f32) + bout_ref[...]
    y_ref[...] = y.astype(y_ref.dtype)

    # ---- shift-register state update (exact rewrite of x0@A + u@Bu + y@Bx) --
    state = xp_ref.shape[-1]
    shift = state - blk                  # (horizon - 1) * (in + out)
    if shift > 0:
        xp_ref[:, :shift] = x0[:, blk:].astype(xp_ref.dtype)
    xp_ref[:, shift:shift + out_features] = y.astype(xp_ref.dtype)
    xp_ref[:, shift + out_features:] = u.astype(xp_ref.dtype)


# --------------------------------------------------------------------------
# Wrapper: no HBM lane padding; only the batch axis is tiled (and padded only
# when B > batch_tile).  Weights stay resident in VMEM (constant index_map).
# --------------------------------------------------------------------------
def nnarx_forward(u, x0, W0, U_list, b_list, U_out, b_out, *,
                  compute_dtype=jnp.float32, batch_tile=_BATCH_TILE):
    f32 = jnp.float32
    u = jnp.asarray(u, f32)
    x0 = jnp.asarray(x0, f32)
    B, in_f = u.shape
    state = x0.shape[1]
    M = len(U_list)
    out_f = U_out.shape[1]
    blk = in_f + out_f
    assert state % blk == 0, "state_size must be horizon * (in_features + out_features)"

    cd = compute_dtype
    W0c = jnp.asarray(W0, f32).astype(cd)
    U_c = [jnp.asarray(Ui, f32).astype(cd) for Ui in U_list]
    b_c = [jnp.asarray(bi, f32).reshape(1, -1) for bi in b_list]      # bias in f32
    Uout_c = jnp.asarray(U_out, f32).astype(cd)
    bout_c = jnp.asarray(b_out, f32).reshape(1, -1)

    # Batch tiling: only pad rows, and only when a real tile split is needed.
    if B <= batch_tile:
        bm, Bp = B, B
    else:
        bm = batch_tile                      # multiple of 8 (f32 sublane)
        Bp = _ceil_to(B, bm)
        if Bp != B:
            u = jnp.pad(u, ((0, Bp - B), (0, 0)))
            x0 = jnp.pad(x0, ((0, Bp - B), (0, 0)))
    grid = (Bp // bm,)

    def streamed(cols):
        return pl.BlockSpec((bm, cols), lambda i: (i, 0))

    def resident(shape):
        return pl.BlockSpec(shape, lambda i: (0, 0))

    in_specs = [streamed(in_f), streamed(state), resident(W0c.shape)]
    in_specs += [resident(Ui.shape) for Ui in U_c]
    in_specs += [resident(bi.shape) for bi in b_c]
    in_specs += [resident(Uout_c.shape), resident(bout_c.shape)]
    out_specs = [streamed(out_f), streamed(state)]

    kern = functools.partial(_nnarx_kernel, num_layers=M, out_features=out_f,
                             blk=blk, compute_dtype=cd)
    y, xp = pl.pallas_call(
        kern,
        out_shape=(
            jax.ShapeDtypeStruct((Bp, out_f), f32),
            jax.ShapeDtypeStruct((Bp, state), f32),
        ),
        grid_spec=pltpu.PrefetchScalarGridSpec(
            num_scalar_prefetch=0,
            grid=grid,
            in_specs=in_specs,
            out_specs=out_specs,
        ),
        compiler_params=pltpu.CompilerParams(
            dimension_semantics=("parallel",),
        ),
    )(u, x0, W0c, *U_c, *b_c, Uout_c, bout_c)

    if Bp != B:
        y, xp = y[:B], xp[:B]
    return y, xp


# --------------------------------------------------------------------------
# Helpers mirroring the PyTorch module's fixed matrices / initial states
# (A / Bu / Bx are built only for the reference check below).
# --------------------------------------------------------------------------
def build_shift_matrices(N, in_features, out_features):
    _a = np.zeros((N, N))
    _a[np.arange(0, N - 1), np.arange(1, N)] = 1
    _b = np.zeros((N, 1))
    _b[-1, 0] = 1
    _bx = np.concatenate([np.eye(out_features), np.zeros([in_features, out_features])], axis=0)
    _bu = np.concatenate([np.zeros([out_features, in_features]), np.eye(in_features)], axis=0)
    _A = np.kron(_a, np.eye(in_features + out_features)).transpose()
    _Bu = np.kron(_b, _bu).transpose()
    _Bx = np.kron(_b, _bx).transpose()
    return (jnp.asarray(_A, jnp.float32),
            jnp.asarray(_Bu, jnp.float32),
            jnp.asarray(_Bx, jnp.float32))


def initial_states(key, n_batches, state_size, stdv=0.5):
    # TODO(synk): PyTorch draws x0 with torch.randn when x0 is None; here the
    # caller supplies a JAX key explicitly.
    return stdv * jax.random.normal(key, (n_batches, state_size), dtype=jnp.float32)


def nnarx_forward_ref(u, x0, W0, U_list, b_list, U_out, b_out, A, Bu, Bx):
    x = x0
    for i in range(len(U_list)):
        if i == 0:
            x = jnp.tanh(u @ W0 + x @ U_list[0] + b_list[0])
        else:
            x = jnp.tanh(x @ U_list[i] + b_list[i])
    y = x @ U_out + b_out
    xp = x0 @ A + u @ Bu + y @ Bx
    return y, xp


if __name__ == "__main__":
    key = jax.random.PRNGKey(0)
    units = [32, 32]
    in_features, out_features, horizon = 4, 2, 8
    batch = 2
    state_size = horizon * (in_features + out_features)  # 48

    ks = jax.random.split(key, 10)
    s0 = 1.0 / units[0]
    s1 = 1.0 / units[1]
    u = jax.random.normal(ks[0], (batch, in_features), dtype=jnp.float32)
    x0 = initial_states(ks[1], batch, state_size)
    W0 = jax.random.uniform(ks[2], (in_features, units[0]), minval=-s0, maxval=s0)
    U0m = jax.random.uniform(ks[3], (state_size, units[0]), minval=-s0, maxval=s0)
    U1m = jax.random.uniform(ks[4], (units[0], units[1]), minval=-s1, maxval=s1)
    b0 = 0.1 * jax.random.normal(ks[5], (units[0],), dtype=jnp.float32)
    b1 = 0.1 * jax.random.normal(ks[6], (units[1],), dtype=jnp.float32)
    U_out = jax.random.uniform(ks[7], (units[1], out_features), minval=-s1, maxval=s1)
    b_out = 0.1 * jax.random.normal(ks[8], (out_features,), dtype=jnp.float32)

    # Reference uses the explicit A/Bu/Bx matmuls, so the shift-register
    # rewrite inside the kernel is validated against the true module math.
    A, Bu, Bx = build_shift_matrices(horizon, in_features, out_features)
    y_expect, xp_expect = nnarx_forward_ref(u, x0, W0, [U0m, U1m], [b0, b1],
                                            U_out, b_out, A, Bu, Bx)

    # f32 path: must match the reference tightly.
    y, xp = nnarx_forward(u, x0, W0, [U0m, U1m], [b0, b1], U_out, b_out)
    (y, xp) = jax.block_until_ready((y, xp))
    assert y.shape == (batch, out_features)
    assert xp.shape == (batch, state_size)
    assert jnp.allclose(y, y_expect, atol=1e-5, rtol=1e-5)
    assert jnp.allclose(xp, xp_expect, atol=1e-5, rtol=1e-5)

    # bf16 matmul-operand fast path (f32 accumulate/bias/tanh, exact state shift).
    y16, xp16 = nnarx_forward(u, x0, W0, [U0m, U1m], [b0, b1], U_out, b_out,
                              compute_dtype=jnp.bfloat16)
    (y16, xp16) = jax.block_until_ready((y16, xp16))
    assert jnp.allclose(y16, y_expect, atol=2e-2, rtol=2e-2)
    assert jnp.allclose(xp16, xp_expect, atol=2e-2, rtol=2e-2)

    print("KERNEL_OK")
</pallas_src>

<mosaic_0001>
module attributes {stable_mosaic.version = 11 : i64} {
  func.func @_nnarx_kernel(%arg0: i32, %arg1: memref<2x4xf32, #tpu.memory_space<vmem>>, %arg2: memref<2x48xf32, #tpu.memory_space<vmem>>, %arg3: memref<4x32xf32, #tpu.memory_space<vmem>>, %arg4: memref<48x32xf32, #tpu.memory_space<vmem>>, %arg5: memref<32x32xf32, #tpu.memory_space<vmem>>, %arg6: memref<1x32xf32, #tpu.memory_space<vmem>>, %arg7: memref<1x32xf32, #tpu.memory_space<vmem>>, %arg8: memref<32x2xf32, #tpu.memory_space<vmem>>, %arg9: memref<1x2xf32, #tpu.memory_space<vmem>>, %arg10: memref<2x2xf32, #tpu.memory_space<vmem>>, %arg11: memref<2x48xf32, #tpu.memory_space<vmem>>) attributes {dimension_semantics = [#tpu.dimension_semantics<parallel>], iteration_bounds = array<i64: 1>, scalar_prefetch = 0 : i64, scratch_operands = 0 : i64, tpu.core_type = #tpu.core_type<tc>, window_params = [{transform_indices = @transform_0, window_bounds = array<i64: 2, 4>}, {transform_indices = @transform_1, window_bounds = array<i64: 2, 48>}, {pipeline_mode = #tpu.pipeline_mode<synchronous>, transform_indices = @transform_2, window_bounds = array<i64: 4, 32>}, {pipeline_mode = #tpu.pipeline_mode<synchronous>, transform_indices = @transform_3, window_bounds = array<i64: 48, 32>}, {pipeline_mode = #tpu.pipeline_mode<synchronous>, transform_indices = @transform_4, window_bounds = array<i64: 32, 32>}, {pipeline_mode = #tpu.pipeline_mode<synchronous>, transform_indices = @transform_5, window_bounds = array<i64: 1, 32>}, {pipeline_mode = #tpu.pipeline_mode<synchronous>, transform_indices = @transform_6, window_bounds = array<i64: 1, 32>}, {pipeline_mode = #tpu.pipeline_mode<synchronous>, transform_indices = @transform_7, window_bounds = array<i64: 32, 2>}, {pipeline_mode = #tpu.pipeline_mode<synchronous>, transform_indices = @transform_8, window_bounds = array<i64: 1, 2>}, {transform_indices = @transform_9, window_bounds = array<i64: 2, 2>}, {transform_indices = @transform_10, window_bounds = array<i64: 2, 48>}]} {
    %c0 = arith.constant 0 : index
    %c0_0 = arith.constant 0 : index
    %0 = vector.load %arg1[%c0, %c0_0] : memref<2x4xf32, #tpu.memory_space<vmem>>, vector<2x4xf32>
    %c0_1 = arith.constant 0 : index
    %c0_2 = arith.constant 0 : index
    %1 = vector.load %arg2[%c0_1, %c0_2] : memref<2x48xf32, #tpu.memory_space<vmem>>, vector<2x48xf32>
    %c0_3 = arith.constant 0 : index
    %c0_4 = arith.constant 0 : index
    %2 = vector.load %arg3[%c0_3, %c0_4] : memref<4x32xf32, #tpu.memory_space<vmem>>, vector<4x32xf32>
    %cst = arith.constant dense<0.000000e+00> : vector<2x32xf32>
    %3 = tpu.matmul %0, %2, %cst {dimension_numbers = #tpu.dot_dimension_numbers<[1], [0], [0], [1], [0, 0, 1, 1], [], []>} : vector<2x4xf32>, vector<4x32xf32>, vector<2x32xf32> -> vector<2x32xf32>
    %c0_5 = arith.constant 0 : index
    %c0_6 = arith.constant 0 : index
    %4 = vector.load %arg4[%c0_5, %c0_6] : memref<48x32xf32, #tpu.memory_space<vmem>>, vector<48x32xf32>
    %cst_7 = arith.constant dense<0.000000e+00> : vector<2x32xf32>
    %5 = tpu.matmul %1, %4, %cst_7 {dimension_numbers = #tpu.dot_dimension_numbers<[1], [0], [0], [1], [0, 0, 1, 1], [], []>} : vector<2x48xf32>, vector<48x32xf32>, vector<2x32xf32> -> vector<2x32xf32>
    %6 = arith.addf %3, %5 : vector<2x32xf32>
    %c0_8 = arith.constant 0 : index
    %c0_9 = arith.constant 0 : index
    %7 = vector.load %arg6[%c0_8, %c0_9] : memref<1x32xf32, #tpu.memory_space<vmem>>, vector<1x32xf32>
    %8 = vector.broadcast %7 : vector<1x32xf32> to vector<2x32xf32>
    %9 = arith.addf %6, %8 : vector<2x32xf32>
    %10 = math.tanh %9 : vector<2x32xf32>
    %c0_10 = arith.constant 0 : index
    %c0_11 = arith.constant 0 : index
    %11 = vector.load %arg5[%c0_10, %c0_11] : memref<32x32xf32, #tpu.memory_space<vmem>>, vector<32x32xf32>
    %cst_12 = arith.constant dense<0.000000e+00> : vector<2x32xf32>
    %12 = tpu.matmul %10, %11, %cst_12 {dimension_numbers = #tpu.dot_dimension_numbers<[1], [0], [0], [1], [0, 0, 1, 1], [], []>} : vector<2x32xf32>, vector<32x32xf32>, vector<2x32xf32> -> vector<2x32xf32>
    %c0_13 = arith.constant 0 : index
    %c0_14 = arith.constant 0 : index
    %13 = vector.load %arg7[%c0_13, %c0_14] : memref<1x32xf32, #tpu.memory_space<vmem>>, vector<1x32xf32>
    %14 = vector.broadcast %13 : vector<1x32xf32> to vector<2x32xf32>
    %15 = arith.addf %12, %14 : vector<2x32xf32>
    %16 = math.tanh %15 : vector<2x32xf32>
    %c0_15 = arith.constant 0 : index
    %c0_16 = arith.constant 0 : index
    %17 = vector.load %arg8[%c0_15, %c0_16] : memref<32x2xf32, #tpu.memory_space<vmem>>, vector<32x2xf32>
    %cst_17 = arith.constant dense<0.000000e+00> : vector<2x2xf32>
    %18 = tpu.matmul %16, %17, %cst_17 {dimension_numbers = #tpu.dot_dimension_numbers<[1], [0], [0], [1], [0, 0, 1, 1], [], []>} : vector<2x32xf32>, vector<32x2xf32>, vector<2x2xf32> -> vector<2x2xf32>
    %c0_18 = arith.constant 0 : index
    %c0_19 = arith.constant 0 : index
    %19 = vector.load %arg9[%c0_18, %c0_19] : memref<1x2xf32, #tpu.memory_space<vmem>>, vector<1x2xf32>
    %20 = vector.broadcast %19 : vector<1x2xf32> to vector<2x2xf32>
    %21 = arith.addf %18, %20 : vector<2x2xf32>
    %c0_20 = arith.constant 0 : index
    %c0_21 = arith.constant 0 : index
    %22 = vector.load %arg10[%c0_20, %c0_21] : memref<2x2xf32, #tpu.memory_space<vmem>>, vector<2x2xf32>
    tpu.vector_store %arg10[%c0_20, %c0_21], %21 {strides = array<i32>} : memref<2x2xf32, #tpu.memory_space<vmem>>, vector<2x2xf32>,
    %23 = vector.extract_strided_slice %1 {offsets = [0, 6], sizes = [2, 42], strides = [1, 1]} : vector<2x48xf32> to vector<2x42xf32>
    %c0_22 = arith.constant 0 : index
    %c0_23 = arith.constant 0 : index
    %24 = vector.load %arg11[%c0_22, %c0_23] : memref<2x48xf32, #tpu.memory_space<vmem>>, vector<2x42xf32>
    tpu.vector_store %arg11[%c0_22, %c0_23], %23 {strides = array<i32>} : memref<2x48xf32, #tpu.memory_space<vmem>>, vector<2x42xf32>,
    %c0_24 = arith.constant 0 : index
    %c42 = arith.constant 42 : index
    %25 = vector.load %arg11[%c0_24, %c42] : memref<2x48xf32, #tpu.memory_space<vmem>>, vector<2x2xf32>
    tpu.vector_store %arg11[%c0_24, %c42], %21 {strides = array<i32>} : memref<2x48xf32, #tpu.memory_space<vmem>>, vector<2x2xf32>,
    %c0_25 = arith.constant 0 : index
    %c44 = arith.constant 44 : index
    %26 = vector.load %arg11[%c0_25, %c44] : memref<2x48xf32, #tpu.memory_space<vmem>>, vector<2x4xf32>
    tpu.vector_store %arg11[%c0_25, %c44], %0 {strides = array<i32>} : memref<2x48xf32, #tpu.memory_space<vmem>>, vector<2x4xf32>,
    return
  }
  func.func @transform_0(%arg0: i32) -> (i32, i32) {
    %c0_i32 = arith.constant 0 : i32
    %c0_i32_0 = arith.constant 0 : i32
    return %arg0, %c0_i32 : i32, i32
  }
  func.func @transform_1(%arg0: i32) -> (i32, i32) {
    %c0_i32 = arith.constant 0 : i32
    %c0_i32_0 = arith.constant 0 : i32
    return %arg0, %c0_i32 : i32, i32
  }
  func.func @transform_2(%arg0: i32) -> (i32, i32) {
    %c0_i32 = arith.constant 0 : i32
    %c0_i32_0 = arith.constant 0 : i32
    %c0_i32_1 = arith.constant 0 : i32
    return %c0_i32, %c0_i32_0 : i32, i32
  }
  func.func @transform_3(%arg0: i32) -> (i32, i32) {
    %c0_i32 = arith.constant 0 : i32
    %c0_i32_0 = arith.constant 0 : i32
    %c0_i32_1 = arith.constant 0 : i32
    return %c0_i32, %c0_i32_0 : i32, i32
  }
  func.func @transform_4(%arg0: i32) -> (i32, i32) {
    %c0_i32 = arith.constant 0 : i32
    %c0_i32_0 = arith.constant 0 : i32
    %c0_i32_1 = arith.constant 0 : i32
    return %c0_i32, %c0_i32_0 : i32, i32
  }
  func.func @transform_5(%arg0: i32) -> (i32, i32) {
    %c0_i32 = arith.constant 0 : i32
    %c0_i32_0 = arith.constant 0 : i32
    %c0_i32_1 = arith.constant 0 : i32
    return %c0_i32, %c0_i32_0 : i32, i32
  }
  func.func @transform_6(%arg0: i32) -> (i32, i32) {
    %c0_i32 = arith.constant 0 : i32
    %c0_i32_0 = arith.constant 0 : i32
    %c0_i32_1 = arith.constant 0 : i32
    return %c0_i32, %c0_i32_0 : i32, i32
  }
  func.func @transform_7(%arg0: i32) -> (i32, i32) {
    %c0_i32 = arith.constant 0 : i32
    %c0_i32_0 = arith.constant 0 : i32
    %c0_i32_1 = arith.constant 0 : i32
    return %c0_i32, %c0_i32_0 : i32, i32
  }
  func.func @transform_8(%arg0: i32) -> (i32, i32) {
    %c0_i32 = arith.constant 0 : i32
    %c0_i32_0 = arith.constant 0 : i32
    %c0_i32_1 = arith.constant 0 : i32
    return %c0_i32, %c0_i32_0 : i32, i32
  }
  func.func @transform_9(%arg0: i32) -> (i32, i32) {
    %c0_i32 = arith.constant 0 : i32
    %c0_i32_0 = arith.constant 0 : i32
    return %arg0, %c0_i32 : i32, i32
  }
  func.func @transform_10(%arg0: i32) -> (i32, i32) {
    %c0_i32 = arith.constant 0 : i32
    %c0_i32_0 = arith.constant 0 : i32
    return %arg0, %c0_i32 : i32, i32
  }
}

</mosaic_0001>

<bundles_post_ra>
// kernel: tpu_custom_call.1
= control target key start
LH: loop header
LB: loop body
LE: loop exit
PB: predicated region body
PF: predicated region fallthrough
CT: control target
= control target key end

     0   :  { %16 = vsyncpa [#allocation3], 0  ;;  %v572_v3 = vmov 0.0|0.0   ;;  %vm573_vm0 = vmmov 0   ;;  %v574_v6 = vmov 0.0   ;;  %s725_s0 = inlined_call_operand.vmem [shape: f32[2,4], index: 0, kind: input, shape index: {}]   ;;  %s726_s1 = inlined_call_operand.vmem [shape: f32[2,48], index: 1, kind: input, shape index: {}]   ;;  %s727_s2 = inlined_call_operand.vmem [shape: f32[4,32], index: 2, kind: input, shape index: {}]   ;;  %s728_s3 = inlined_call_operand.vmem [shape: f32[48,32], index: 3, kind: input, shape index: {}]   ;;  %s729_s4 = inlined_call_operand.vmem [shape: f32[32,32], index: 4, kind: input, shape index: {}]   ;;  %s730_s5 = inlined_call_operand.vmem [shape: f32[1,32], index: 5, kind: input, shape index: {}]   ;;  %s731_s6 = inlined_call_operand.vmem [shape: f32[1,32], index: 6, kind: input, shape index: {}]   ;;  %s732_s7 = inlined_call_operand.vmem [shape: f32[32,2], index: 7, kind: input, shape index: {}]   ;;  %s733_s8 = inlined_call_operand.vmem [shape: f32[1,2], index: 8, kind: input, shape index: {}]   ;;  %s734_s9 = inlined_call_operand.hbm [shape: f32[2,2], index: 9, kind: output, shape index: {0}]   ;;  %s735_s10 = inlined_call_operand.hbm [shape: f32[2,48], index: 10, kind: output, shape index: {1}]  }
   0x1   :  { %v39_v0 = vld [vmem:[%s728_s3] sm:$0xff]  ;;  %v40_v1 = vld [vmem:[%s728_s3 + $0x8] sm:$0xff]  ;;  %v41_v2 = vld [vmem:[%s728_s3 + $0x10] sm:$0xff]  ;;  %491 = vmatprep.subr.bf16.mxu0 %v572_v3  ;;  %461 = vmatprep.mubr.msk.f32.mxu0 %vm573_vm0, %v574_v6 }
   0x2   :  { %v492_v4 = vpack.c.bf16 %v40_v1, %v39_v0  ;;  %v42_v5 = vld [vmem:[%s728_s3 + $0x18] sm:$0xff]  ;;  %500 = vmatprep.subr.bf16.mxu1 %v572_v3  ;;  %477 = vmatprep.mubr.msk.f32.mxu1 %vm573_vm0, %v574_v6 }
   0x3   :  { %v495_v7 = vpack.c.bf16 %v42_v5, %v41_v2 }
   0x4   :  { %493 = vmatpush3.bf16.msra.mxu0 %v492_v4 }
   0x5   :  { %17 = vsyncpa [#allocation5], 0  ;;  %494 = vmatprep.subr.bf16.mxu0 %v572_v3  ;;  %v43_v8 = vld [vmem:[%s728_s3 + $0x20] sm:$0xff]  ;;  %v44_v9 = vld [vmem:[%s728_s3 + $0x28] sm:$0xff]  ;;  %vm45_vm1 = vcmask 392192   ;;  %vm123_vm2 = vcmask 1043456  }
   0x6   :  { %v498_v10 = vpack.c.bf16 %v44_v9, %v43_v8  ;;  %v37_v11 = vld [vmem:[%s726_s1] sm:$0x3]  ;;  %vm119_vm3 = vcmask 31744   ;;  %v207_v15 = vld [vmem:[%s729_s4 + $0x8] sm:$0xff]  ;;  %v208_v16 = vld [vmem:[%s729_s4 + $0x10] sm:$0xff]  ;;  %vm217_vm4 = vcmask 261120  }
   0x7   :  { %v38_v12 = vld [vmem:[%s727_s2] sm:$0xf]  ;;  %v209_v18 = vld [vmem:[%s729_s4 + $0x18] sm:$0xff]  ;;  %v293_v29 = vld [vmem:[%s732_s7 + $0x8] sm:$0xff]  ;;  %s575_s23 = smov 122   ;;  %vm381_vm5 = vcmask 336896  }
   0x8   :  { %496 = vmatpush3.bf16.msra.mxu0 %v495_v7  ;;  %v36_v13 = vld [vmem:[%s725_s0] sm:$0x3]  ;;  %v504_v19 = vpack.c.bf16 %v209_v18, %v208_v16  ;;  %v294_v30 = vld [vmem:[%s732_s7 + $0x10] sm:$0xff]  ;;  %v295_v32 = vld [vmem:[%s732_s7 + $0x18] sm:$0xff]  ;;  %378 = vrot.lane.b32.xlu0 %v37_v11, %s575_s23  ;;  %s577_s28 = smov [#allocation2]   ;;  %vm376_vm6 = vcmask 9216  }
   0x9   :  { %497 = vmatprep.subr.bf16.mxu0 %v572_v3  ;;  %v206_v14 = vld [vmem:[%s729_s4] sm:$0xff]  ;;  %v510_v33 = vpack.c.bf16 %v295_v32, %v294_v30  ;;  %s400_s3 = sshll.u32 %s577_s28, 4  ;;  %s401_s3 = int_to_ptr.vmem [resolvable:$true] %s400_s3 }
   0xa   :  { %v501_v17 = vpack.c.bf16 %v207_v15, %v206_v14  ;;  %v425_v23 = vld [vmem:[%s730_s5] ss:$0 sm:$0xff]  ;;  %s524_s29 = scalar_lea.vmem %s401_s3, 32  ;;  %p529_p1 = scmp.lt.s32.totalorder %s401_s3, %s401_s3 }
   0xb   :  { %v292_v28 = vld [vmem:[%s732_s7] sm:$0xff]  ;;  %s576_s7 = smov 44   ;;  %p525_p0 = scmp.ne.s32.totalorder %s401_s3, %s524_s29 }
   0xc   :  { %499 = vmatpush3.bf16.msra.mxu0 %v498_v10  ;;  %502 = vmatpush3.bf16.msra.mxu1 %v501_v17  ;;  %v507_v31 = vpack.c.bf16 %v293_v29, %v292_v28  ;;  %v426_v34 = vld [vmem:[%s731_s6] ss:$0 sm:$0xff]  ;;  %s578_s6 = smov 42   ;;  %p530_p2 = scmp.lt.s32.totalorder %s524_s29, %s524_s29 }
   0xd   :  { %464 = vmatprep.subr.mxu0 %v574_v6  ;;  %503 = vmatprep.subr.bf16.mxu1 %v572_v3  ;;  %v428_v40 = vld [vmem:[%s733_s8] ss:$0 sm:$0xff] }
   0xe   :  { %389 = vrot.lane.b32.xlu1 %v36_v13, %s576_s7  ;;  %p531_p3 = por %p530_p2, %p529_p1 }
   0xf   :  { %462 = vmatmul.mubr.msk.f32.vlgmr.msra.gmra.mrb[0].mxu0 %vm45_vm1, %v37_v11 }
  0x10   :  { %465 = vmatpush3.msk.msra.mxu0 %vm123_vm2, %v38_v12  ;;  %466 = vmatprep.mubr.msk.f32.mxu0 %vm573_vm0, %v574_v6  ;;  %p532_p4 = pnand %p531_p3, %p525_p0 }
  0x11   :  { %505 = vmatpush3.bf16.msra.mxu1 %v504_v19 }
  0x12   :  { %506 = vmatprep.subr.bf16.mxu1 %v572_v3 }
  0x13   :  { %467 = vmatmul.mubr.msk.f32.vlgmr.msra.gmra.mrb[2].mxu0 %vm119_vm3, %v36_v13 }
  0x7a   :  { %v379_v39 = vpop.permute.xlu0 %378 }
  0x7b   :  { %382 = vst.msk [vmem:[#allocation4] sm:$0x3] %vm381_vm5, %v379_v39 }
  0xe2   :  { %v115_v20 = vpop.f32.mrb[0].mxu0 }
  0xe3   :  { %v463_v21 = vpop.f32.mrb[1].mxu0 }
  0xe6   :  { %v193_v22 = vpop.f32.mrb[2].mxu0 }
  0xe7   :  { %v194_v24 = vadd.f32 %v193_v22, %v115_v20  ;;  %v468_v25 = vpop.f32.mrb[3].mxu0 }
  0xe9   :  { %v204_v26 = vadd.f32 %v425_v23, %v194_v24 }
  0xeb   :  { %520 = vtanh.f32 %v204_v26 }
  0xf5   :  { %v521_v27 = vpop.eup %520 }
  0xf6   :  { %478 = vmatmul.mubr.msk.f32.vlgmr.msra.gmra.mrb[0].mxu1 %vm217_vm4, %v521_v27 }
  0xf7   :  { %488 = vmatprep.mubr.msk.f32.mxu1 %vm573_vm0, %v574_v6  ;;  %508 = vmatpush3.bf16.msra.mxu1 %v507_v31 }
  0xf8   :  { %509 = vmatprep.subr.bf16.mxu1 %v572_v3 }
  0xfb   :  { %511 = vmatpush3.bf16.msra.mxu1 %v510_v33 }
 0x1c9   :  { %v287_v35 = vpop.f32.mrb[0].mxu1 }
 0x1ca   :  { %v288_v36 = vadd.f32 %v426_v34, %v287_v35  ;;  %v479_v37 = vpop.f32.mrb[1].mxu1 }
 0x1cc   :  { %522 = vtanh.f32 %v288_v36 }
 0x1d6   :  { %v523_v38 = vpop.eup %522 }
 0x1d7   :  { %489 = vmatmul.mubr.msk.f32.vlgmr.msra.gmra.mrb[2].mxu1 %vm217_vm4, %v523_v38 }
 0x2aa   :  { %v372_v41 = vpop.f32.mrb[2].mxu1 }
 0x2ab   :  { %v373_v42 = vadd.f32 %v428_v40, %v372_v41  ;;  %v490_v43 = vpop.f32.mrb[3].mxu1 }
 0x2ad   :  { %384 = vrot.lane.b32.xlu0 %v373_v42, %s578_s6  ;;  %377 = vst.msk [vmem:[#allocation2] sm:$0x3] %vm376_vm6, %v373_v42 }
 0x2ae   :  { %535 = shalt.err (!%p532_p4)
}
 0x2af   :  { %s536_s8 = scalar_lea.hbm %s734_s9, 32 }
 0x2b0   :  { %p537_p5 = scmp.ne.s32.totalorder %s734_s9, %s536_s8  ;;  %p540_p6 = scmp.lt.u32.totalorder %s536_s8, %s734_s9 }
 0x2b2   :  { %p542_p7 = pnand %p540_p6, %p537_p5 }
 0x2b4   :  { %545 = shalt.err (!%p542_p7)
}
 0x2b5   :  { %403 = dma.vmem_to_hbm [thread:$0]  %s401_s3, 32, %s734_s9, [#allocation3]   ;;  %vm387_vm7 = vcmask 353616   ;;  %v390_v44 = vpop.permute.xlu1 %389  ;;  %vm392_vm8 = vcmask 386400  }
 0x2b6   :  { %s579_s0 = smov [#allocation4]  }
 0x2b7   :  { %s410_s16 = sshll.u32 %s579_s0, 4  ;;  %s411_s16 = int_to_ptr.vmem [resolvable:$true] %s410_s16 }
 0x2b8   :  { %s546_s4 = scalar_lea.vmem %s411_s16, 32  ;;  %p551_p9 = scmp.lt.s32.totalorder %s411_s16, %s411_s16 }
 0x2b9   :  { %p547_p8 = scmp.ne.s32.totalorder %s411_s16, %s546_s4  ;;  %p552_p10 = scmp.lt.s32.totalorder %s546_s4, %s546_s4 }
 0x2bb   :  { %p553_p11 = por %p552_p10, %p551_p9 }
 0x2bd   :  { %p554_p12 = pnand %p553_p11, %p547_p8 }
 0x31f   :  { %v385_v45 = vpop.permute.xlu0 %384 }
 0x320   :  { %388 = vst.msk [vmem:[#allocation4] sm:$0x3] %vm387_vm7, %v385_v45 }
 0x321   :  { %393 = vst.msk [vmem:[#allocation4] sm:$0x3] %vm392_vm8, %v390_v44 }
 0x322   :  { %557 = shalt.err (!%p554_p12)
}
 0x323   :  { %s558_s9 = scalar_lea.hbm %s735_s10, 32 }
 0x324   :  { %p559_p13 = scmp.ne.s32.totalorder %s735_s10, %s558_s9  ;;  %p562_p0 = scmp.lt.u32.totalorder %s558_s9, %s735_s10 }
 0x326   :  { %p564_p1 = pnand %p562_p0, %p559_p13 }
 0x328   :  { %567 = shalt.err (!%p564_p1)
}
 0x329   :  { %413 = dma.vmem_to_hbm [thread:$0]  %s411_s16, 32, %s735_s10, [#allocation5]  }
 0x32a   :  { %568 = dma.done.wait [#allocation3], 32  }
 0x32b   :  { %569 = vsyncadd [#allocation3], 4294967264 }
 0x32c   :  { %570 = dma.done.wait [#allocation5], 32  }
 0x32d   :  { %571 = vsyncadd [#allocation5], 4294967264 }
 0x32e   :  { %420 = vsyncpa [#allocation3], 1 }
 0x32f   :  { %421 = vsyncpa [#allocation5], 1 }

</bundles_post_ra>
